<compile_context>
chip_gen: v5e
topology: v5e:2x2
jax: 0.10.0
libtpu: 0.0.40
codegen_flags: <defaults>
</compile_context>

<pallas_src>
import functools

import jax
import jax.numpy as jnp
from jax import lax
from jax.experimental import pallas as pl
from jax.experimental.pallas import tpu as pltpu

NEG_BIG = -1e30  # finite stand-in for -inf on padded logit lanes


def rnn_seq_kernel(x_ref, wx_ref, wh_ref, b_ref, h0_ref,
                   out_ref, hfin_ref, xw_scr, *, hidden_size, unroll):
    seq_len, b_pad, i_pad = x_ref.shape
    n = wx_ref.shape[1]                      # H + O_pad

    # ---- Preamble: hoisted input projection (off the serial critical path).
    # Each (b_pad, i_pad) = (8, 128) slab is a whole vreg tile, so the reshape
    # to (T*b_pad, i_pad) is layout-trivial.  One batched MXU pass + bias add.
    x_all = x_ref[...].reshape(seq_len * b_pad, i_pad)
    xw = jnp.dot(x_all, wx_ref[...],
                 preferred_element_type=jnp.float32) + b_ref[...]
    xw_scr[...] = xw.reshape(seq_len, b_pad, n)

    wh = wh_ref[...]                         # (H, n), resident in VMEM/vregs

    # ---- Serial recurrence, fully inside this single grid step.
    def step(t, h):
        acc = xw_scr[t] + jnp.dot(h, wh, preferred_element_type=jnp.float32)
        h_new = acc[:, :hidden_size]         # (b_pad, H)   lane-aligned slice
        logits = acc[:, hidden_size:]        # (b_pad, O_pad), padded ~ -1e30

        # LogSoftmax over the lane axis; padded lanes contribute exp(.)=0.
        # Independent of h_new, so it can overlap the next step's h @ W_h.
        m = jnp.max(logits, axis=1, keepdims=True)
        z = logits - m
        lse = jnp.log(jnp.sum(jnp.exp(z), axis=1, keepdims=True))
        out_ref[t] = (z - lse).astype(out_ref.dtype)
        return h_new

    h_final = lax.fori_loop(0, seq_len, step, h0_ref[...], unroll=unroll)
    hfin_ref[...] = h_final.astype(hfin_ref.dtype)


def prepare_rnn_params(w_i2h, b_i2h, w_i2o, b_i2o, input_size,
                       *, i_pad=128, o_pad=128):
    """One-time weight prep: transpose/split the concat, fuse heads, pad.

    w_i2h: (H, I+H) PyTorch Linear layout, w_i2o: (O, I+H).
    Returns (W_x (i_pad, H+o_pad), W_h (H, H+o_pad), bias (1, H+o_pad)).
    Padded output columns get zero weights and a -1e30 bias so log_softmax
    over the padded lanes equals log_softmax over the real O columns.
    """
    H = w_i2h.shape[0]
    O = w_i2o.shape[0]
    I = input_size

    w_i2h_t = jnp.transpose(w_i2h)            # (I+H, H)
    w_i2o_t = jnp.transpose(w_i2o)            # (I+H, O)
    wih_x, wih_h = w_i2h_t[:I], w_i2h_t[I:]   # (I, H), (H, H)
    wio_x, wio_h = w_i2o_t[:I], w_i2o_t[I:]   # (I, O), (H, O)

    wio_x = jnp.pad(wio_x, ((0, 0), (0, o_pad - O)))
    wio_h = jnp.pad(wio_h, ((0, 0), (0, o_pad - O)))

    w_x = jnp.concatenate([wih_x, wio_x], axis=1)       # (I, H+o_pad)
    w_h = jnp.concatenate([wih_h, wio_h], axis=1)       # (H, H+o_pad)
    w_x = jnp.pad(w_x, ((0, i_pad - I), (0, 0)))        # (i_pad, H+o_pad)

    bias = jnp.concatenate([
        b_i2h.astype(jnp.float32),
        b_i2o.astype(jnp.float32),
        jnp.full((o_pad - O,), NEG_BIG, jnp.float32),
    ]).reshape(1, H + o_pad)

    return w_x.astype(jnp.float32), w_h.astype(jnp.float32), bias


def rnn_sequence(x_seq, h0, w_x, w_h, bias, *, hidden_size, output_size):
    """Run the full T-step recurrence in one pallas_call (one grid step).

    x_seq: (T, B, I), h0: (B, H).
    Returns (log_probs (T, B, O), final_hidden (B, H)).
    """
    T, B, I = x_seq.shape
    H = hidden_size
    i_pad, n = w_x.shape          # n = H + O_pad
    o_pad = n - H
    b_pad = max(8, ((B + 7) // 8) * 8)

    x_p = jnp.pad(x_seq.astype(jnp.float32),
                  ((0, 0), (0, b_pad - B), (0, i_pad - I)))
    h_p = jnp.pad(h0.astype(jnp.float32), ((0, b_pad - B), (0, 0)))

    kernel = functools.partial(rnn_seq_kernel, hidden_size=H,
                               unroll=bool(T <= 32))

    # Everything (x_seq ~4 KiB/step, weights ~260 KiB, outputs) fits VMEM for
    # any reasonable T on v5e/v6e/v7x; chunk the time axis only for T >> 10^4.
    out_seq, h_fin = pl.pallas_call(
        kernel,
        out_shape=(jax.ShapeDtypeStruct((T, b_pad, o_pad), jnp.float32),
                   jax.ShapeDtypeStruct((b_pad, H), jnp.float32)),
        grid=(1,),
        in_specs=[
            pl.BlockSpec((T, b_pad, i_pad), lambda i: (0, 0, 0)),  # x_seq
            pl.BlockSpec((i_pad, n), lambda i: (0, 0)),            # W_x
            pl.BlockSpec((H, n), lambda i: (0, 0)),                # W_h
            pl.BlockSpec((1, n), lambda i: (0, 0)),                # bias
            pl.BlockSpec((b_pad, H), lambda i: (0, 0)),            # h0
        ],
        out_specs=(
            pl.BlockSpec((T, b_pad, o_pad), lambda i: (0, 0, 0)),  # log-probs
            pl.BlockSpec((b_pad, H), lambda i: (0, 0)),            # final h
        ),
        scratch_shapes=[pltpu.VMEM((T, b_pad, n), jnp.float32)],   # xw[t]
        compiler_params=pltpu.CompilerParams(
            dimension_semantics=("arbitrary",)),                   # recurrence
    )(x_p, w_x, w_h, bias, h_p)

    return out_seq[:, :B, :output_size], h_fin[:B]


def rnn_forward(x, hidden, w_x, w_h, bias, *, hidden_size, output_size):
    """Single RNN cell step (PyTorch RNN.forward semantics)."""
    out_seq, h_new = rnn_sequence(x[None], hidden, w_x, w_h, bias,
                                  hidden_size=hidden_size,
                                  output_size=output_size)
    return out_seq[0], h_new


if __name__ == "__main__":
    # Shapes implied by the classic char-RNN: letters_len=57, category_len=18.
    INPUT_SIZE = 57
    HIDDEN_SIZE = 128
    OUTPUT_SIZE = 18
    BATCH = 2
    SEQ_LEN = 8

    key = jax.random.PRNGKey(0)
    kx, k1, k2, k3, k4 = jax.random.split(key, 5)

    fan_in = INPUT_SIZE + HIDDEN_SIZE
    bound = 1.0 / jnp.sqrt(jnp.float32(fan_in))
    w_i2h = jax.random.uniform(k1, (HIDDEN_SIZE, fan_in), jnp.float32, -bound, bound)
    b_i2h = jax.random.uniform(k2, (HIDDEN_SIZE,), jnp.float32, -bound, bound)
    w_i2o = jax.random.uniform(k3, (OUTPUT_SIZE, fan_in), jnp.float32, -bound, bound)
    b_i2o = jax.random.uniform(k4, (OUTPUT_SIZE,), jnp.float32, -bound, bound)

    x_seq = jax.random.normal(kx, (SEQ_LEN, BATCH, INPUT_SIZE), jnp.float32)
    hidden0 = jnp.zeros((BATCH, HIDDEN_SIZE), jnp.float32)   # init_hidden()

    # One-time parameter prep (outside the per-sequence / per-step path).
    w_x, w_h, bias = prepare_rnn_params(w_i2h, b_i2h, w_i2o, b_i2o, INPUT_SIZE)

    # Fused-sequence kernel (evaluate()-style loop, single pallas_call).
    out_seq, h_final = rnn_sequence(x_seq, hidden0, w_x, w_h, bias,
                                    hidden_size=HIDDEN_SIZE,
                                    output_size=OUTPUT_SIZE)
    jax.block_until_ready((out_seq, h_final))

    # Pure-JAX reference: step-by-step PyTorch semantics.
    h_ref = hidden0
    outs_ref = []
    for t in range(SEQ_LEN):
        combined = jnp.concatenate([x_seq[t], h_ref], axis=1)
        h_ref = combined @ w_i2h.T + b_i2h
        outs_ref.append(jax.nn.log_softmax(combined @ w_i2o.T + b_i2o, axis=1))
    outs_ref = jnp.stack(outs_ref)

    assert jnp.allclose(out_seq, outs_ref, atol=1e-4, rtol=1e-4), "output mismatch"
    assert jnp.allclose(h_final, h_ref, atol=1e-4, rtol=1e-4), "hidden mismatch"

    # Single-step forward (exact nn.Module.forward signature) also checked.
    out1, h1 = rnn_forward(x_seq[0], hidden0, w_x, w_h, bias,
                           hidden_size=HIDDEN_SIZE, output_size=OUTPUT_SIZE)
    jax.block_until_ready((out1, h1))
    combined = jnp.concatenate([x_seq[0], hidden0], axis=1)
    assert jnp.allclose(out1, jax.nn.log_softmax(combined @ w_i2o.T + b_i2o, axis=1),
                        atol=1e-4, rtol=1e-4), "single-step output mismatch"
    assert jnp.allclose(h1, combined @ w_i2h.T + b_i2h,
                        atol=1e-4, rtol=1e-4), "single-step hidden mismatch"

    # TODO(synk): train()/NLLLoss/backward, save/load and predict() top-k
    # printing are host-side / training utilities, not part of forward.
    print("KERNEL_OK")
</pallas_src>

<mosaic_0001>
module attributes {stable_mosaic.version = 11 : i64} {
  func.func @rnn_seq_kernel(%arg0: i32, %arg1: memref<8x8x128xf32, #tpu.memory_space<vmem>>, %arg2: memref<128x256xf32, #tpu.memory_space<vmem>>, %arg3: memref<128x256xf32, #tpu.memory_space<vmem>>, %arg4: memref<1x256xf32, #tpu.memory_space<vmem>>, %arg5: memref<8x128xf32, #tpu.memory_space<vmem>>, %arg6: memref<8x8x128xf32, #tpu.memory_space<vmem>>, %arg7: memref<8x128xf32, #tpu.memory_space<vmem>>, %arg8: memref<8x8x256xf32, #tpu.memory_space<vmem>>) attributes {dimension_semantics = [#tpu.dimension_semantics<arbitrary>], iteration_bounds = array<i64: 1>, scalar_prefetch = 0 : i64, scratch_operands = 1 : i64, tpu.core_type = #tpu.core_type<tc>, window_params = [{pipeline_mode = #tpu.pipeline_mode<synchronous>, transform_indices = @transform_0, window_bounds = array<i64: 8, 8, 128>}, {pipeline_mode = #tpu.pipeline_mode<synchronous>, transform_indices = @transform_1, window_bounds = array<i64: 128, 256>}, {pipeline_mode = #tpu.pipeline_mode<synchronous>, transform_indices = @transform_2, window_bounds = array<i64: 128, 256>}, {pipeline_mode = #tpu.pipeline_mode<synchronous>, transform_indices = @transform_3, window_bounds = array<i64: 1, 256>}, {pipeline_mode = #tpu.pipeline_mode<synchronous>, transform_indices = @transform_4, window_bounds = array<i64: 8, 128>}, {pipeline_mode = #tpu.pipeline_mode<synchronous>, transform_indices = @transform_5, window_bounds = array<i64: 8, 8, 128>}, {pipeline_mode = #tpu.pipeline_mode<synchronous>, transform_indices = @transform_6, window_bounds = array<i64: 8, 128>}]} {
    %c0 = arith.constant 0 : index
    %c0_0 = arith.constant 0 : index
    %c0_1 = arith.constant 0 : index
    %0 = vector.load %arg1[%c0, %c0_0, %c0_1] : memref<8x8x128xf32, #tpu.memory_space<vmem>>, vector<8x8x128xf32>
    %1 = vector.shape_cast %0 : vector<8x8x128xf32> to vector<64x128xf32>
    %c0_2 = arith.constant 0 : index
    %c0_3 = arith.constant 0 : index
    %2 = vector.load %arg2[%c0_2, %c0_3] : memref<128x256xf32, #tpu.memory_space<vmem>>, vector<128x256xf32>
    %cst = arith.constant dense<0.000000e+00> : vector<64x256xf32>
    %3 = tpu.matmul %1, %2, %cst {dimension_numbers = #tpu.dot_dimension_numbers<[1], [0], [0], [1], [0, 0, 1, 1], [], []>} : vector<64x128xf32>, vector<128x256xf32>, vector<64x256xf32> -> vector<64x256xf32>
    %c0_4 = arith.constant 0 : index
    %c0_5 = arith.constant 0 : index
    %4 = vector.load %arg4[%c0_4, %c0_5] : memref<1x256xf32, #tpu.memory_space<vmem>>, vector<1x256xf32>
    %5 = vector.broadcast %4 : vector<1x256xf32> to vector<64x256xf32>
    %6 = arith.addf %3, %5 : vector<64x256xf32>
    %7 = vector.shape_cast %6 : vector<64x256xf32> to vector<8x8x256xf32>
    %c0_6 = arith.constant 0 : index
    %c0_7 = arith.constant 0 : index
    %c0_8 = arith.constant 0 : index
    %8 = vector.load %arg8[%c0_6, %c0_7, %c0_8] : memref<8x8x256xf32, #tpu.memory_space<vmem>>, vector<8x8x256xf32>
    tpu.vector_store %arg8[%c0_6, %c0_7, %c0_8], %7 {strides = array<i32>} : memref<8x8x256xf32, #tpu.memory_space<vmem>>, vector<8x8x256xf32>,
    %c0_9 = arith.constant 0 : index
    %c0_10 = arith.constant 0 : index
    %9 = vector.load %arg3[%c0_9, %c0_10] : memref<128x256xf32, #tpu.memory_space<vmem>>, vector<128x256xf32>
    %c0_11 = arith.constant 0 : index
    %c0_12 = arith.constant 0 : index
    %10 = vector.load %arg5[%c0_11, %c0_12] : memref<8x128xf32, #tpu.memory_space<vmem>>, vector<8x128xf32>
    %c0_i32 = arith.constant 0 : i32
    %11 = arith.index_cast %c0_i32 : i32 to index
    %c0_13 = arith.constant 0 : index
    %c0_14 = arith.constant 0 : index
    %12 = vector.load %arg8[%11, %c0_13, %c0_14] : memref<8x8x256xf32, #tpu.memory_space<vmem>>, vector<1x8x256xf32>
    %13 = vector.shape_cast %12 : vector<1x8x256xf32> to vector<8x256xf32>
    %cst_15 = arith.constant dense<0.000000e+00> : vector<8x256xf32>
    %14 = tpu.matmul %10, %9, %cst_15 {dimension_numbers = #tpu.dot_dimension_numbers<[1], [0], [0], [1], [0, 0, 1, 1], [], []>} : vector<8x128xf32>, vector<128x256xf32>, vector<8x256xf32> -> vector<8x256xf32>
    %15 = arith.addf %13, %14 : vector<8x256xf32>
    %16 = vector.extract_strided_slice %15 {offsets = [0, 0], sizes = [8, 128], strides = [1, 1]} : vector<8x256xf32> to vector<8x128xf32>
    %17 = vector.extract_strided_slice %15 {offsets = [0, 128], sizes = [8, 128], strides = [1, 1]} : vector<8x256xf32> to vector<8x128xf32>
    %cst_16 = arith.constant dense<0xFF800000> : vector<8xf32>
    %18 = vector.multi_reduction <maximumf>, %17, %cst_16 [1] : vector<8x128xf32> to vector<8xf32>
    %19 = vector.shape_cast %18 : vector<8xf32> to vector<8x1xf32>
    %20 = vector.broadcast %19 : vector<8x1xf32> to vector<8x128xf32>
    %21 = arith.subf %17, %20 : vector<8x128xf32>
    %22 = math.exp %21 : vector<8x128xf32>
    %cst_17 = arith.constant dense<0.000000e+00> : vector<8xf32>
    %23 = vector.multi_reduction <add>, %22, %cst_17 [1] : vector<8x128xf32> to vector<8xf32>
    %24 = vector.shape_cast %23 : vector<8xf32> to vector<8x1xf32>
    %25 = math.log %24 : vector<8x1xf32>
    %26 = vector.broadcast %25 : vector<8x1xf32> to vector<8x128xf32>
    %27 = arith.subf %21, %26 : vector<8x128xf32>
    %28 = arith.index_cast %c0_i32 : i32 to index
    %c0_18 = arith.constant 0 : index
    %c0_19 = arith.constant 0 : index
    %29 = vector.load %arg6[%28, %c0_18, %c0_19] : memref<8x8x128xf32, #tpu.memory_space<vmem>>, vector<1x8x128xf32>
    %30 = vector.shape_cast %29 : vector<1x8x128xf32> to vector<8x128xf32>
    %31 = vector.shape_cast %27 : vector<8x128xf32> to vector<1x8x128xf32>
    tpu.vector_store %arg6[%28, %c0_18, %c0_19], %31 {strides = array<i32>} : memref<8x8x128xf32, #tpu.memory_space<vmem>>, vector<1x8x128xf32>,
    %c1_i32 = arith.constant 1 : i32
    %32 = arith.index_cast %c1_i32 : i32 to index
    %c0_20 = arith.constant 0 : index
    %c0_21 = arith.constant 0 : index
    %33 = vector.load %arg8[%32, %c0_20, %c0_21] : memref<8x8x256xf32, #tpu.memory_space<vmem>>, vector<1x8x256xf32>
    %34 = vector.shape_cast %33 : vector<1x8x256xf32> to vector<8x256xf32>
    %cst_22 = arith.constant dense<0.000000e+00> : vector<8x256xf32>
    %35 = tpu.matmul %16, %9, %cst_22 {dimension_numbers = #tpu.dot_dimension_numbers<[1], [0], [0], [1], [0, 0, 1, 1], [], []>} : vector<8x128xf32>, vector<128x256xf32>, vector<8x256xf32> -> vector<8x256xf32>
    %36 = arith.addf %34, %35 : vector<8x256xf32>
    %37 = vector.extract_strided_slice %36 {offsets = [0, 0], sizes = [8, 128], strides = [1, 1]} : vector<8x256xf32> to vector<8x128xf32>
    %38 = vector.extract_strided_slice %36 {offsets = [0, 128], sizes = [8, 128], strides = [1, 1]} : vector<8x256xf32> to vector<8x128xf32>
    %cst_23 = arith.constant dense<0xFF800000> : vector<8xf32>
    %39 = vector.multi_reduction <maximumf>, %38, %cst_23 [1] : vector<8x128xf32> to vector<8xf32>
    %40 = vector.shape_cast %39 : vector<8xf32> to vector<8x1xf32>
    %41 = vector.broadcast %40 : vector<8x1xf32> to vector<8x128xf32>
    %42 = arith.subf %38, %41 : vector<8x128xf32>
    %43 = math.exp %42 : vector<8x128xf32>
    %cst_24 = arith.constant dense<0.000000e+00> : vector<8xf32>
    %44 = vector.multi_reduction <add>, %43, %cst_24 [1] : vector<8x128xf32> to vector<8xf32>
    %45 = vector.shape_cast %44 : vector<8xf32> to vector<8x1xf32>
    %46 = math.log %45 : vector<8x1xf32>
    %47 = vector.broadcast %46 : vector<8x1xf32> to vector<8x128xf32>
    %48 = arith.subf %42, %47 : vector<8x128xf32>
    %49 = arith.index_cast %c1_i32 : i32 to index
    %c0_25 = arith.constant 0 : index
    %c0_26 = arith.constant 0 : index
    %50 = vector.load %arg6[%49, %c0_25, %c0_26] : memref<8x8x128xf32, #tpu.memory_space<vmem>>, vector<1x8x128xf32>
    %51 = vector.shape_cast %50 : vector<1x8x128xf32> to vector<8x128xf32>
    %52 = vector.shape_cast %48 : vector<8x128xf32> to vector<1x8x128xf32>
    tpu.vector_store %arg6[%49, %c0_25, %c0_26], %52 {strides = array<i32>} : memref<8x8x128xf32, #tpu.memory_space<vmem>>, vector<1x8x128xf32>,
    %c2_i32 = arith.constant 2 : i32
    %53 = arith.index_cast %c2_i32 : i32 to index
    %c0_27 = arith.constant 0 : index
    %c0_28 = arith.constant 0 : index
    %54 = vector.load %arg8[%53, %c0_27, %c0_28] : memref<8x8x256xf32, #tpu.memory_space<vmem>>, vector<1x8x256xf32>
    %55 = vector.shape_cast %54 : vector<1x8x256xf32> to vector<8x256xf32>
    %cst_29 = arith.constant dense<0.000000e+00> : vector<8x256xf32>
    %56 = tpu.matmul %37, %9, %cst_29 {dimension_numbers = #tpu.dot_dimension_numbers<[1], [0], [0], [1], [0, 0, 1, 1], [], []>} : vector<8x128xf32>, vector<128x256xf32>, vector<8x256xf32> -> vector<8x256xf32>
    %57 = arith.addf %55, %56 : vector<8x256xf32>
    %58 = vector.extract_strided_slice %57 {offsets = [0, 0], sizes = [8, 128], strides = [1, 1]} : vector<8x256xf32> to vector<8x128xf32>
    %59 = vector.extract_strided_slice %57 {offsets = [0, 128], sizes = [8, 128], strides = [1, 1]} : vector<8x256xf32> to vector<8x128xf32>
    %cst_30 = arith.constant dense<0xFF800000> : vector<8xf32>
    %60 = vector.multi_reduction <maximumf>, %59, %cst_30 [1] : vector<8x128xf32> to vector<8xf32>
    %61 = vector.shape_cast %60 : vector<8xf32> to vector<8x1xf32>
    %62 = vector.broadcast %61 : vector<8x1xf32> to vector<8x128xf32>
    %63 = arith.subf %59, %62 : vector<8x128xf32>
    %64 = math.exp %63 : vector<8x128xf32>
    %cst_31 = arith.constant dense<0.000000e+00> : vector<8xf32>
    %65 = vector.multi_reduction <add>, %64, %cst_31 [1] : vector<8x128xf32> to vector<8xf32>
    %66 = vector.shape_cast %65 : vector<8xf32> to vector<8x1xf32>
    %67 = math.log %66 : vector<8x1xf32>
    %68 = vector.broadcast %67 : vector<8x1xf32> to vector<8x128xf32>
    %69 = arith.subf %63, %68 : vector<8x128xf32>
    %70 = arith.index_cast %c2_i32 : i32 to index
    %c0_32 = arith.constant 0 : index
    %c0_33 = arith.constant 0 : index
    %71 = vector.load %arg6[%70, %c0_32, %c0_33] : memref<8x8x128xf32, #tpu.memory_space<vmem>>, vector<1x8x128xf32>
    %72 = vector.shape_cast %71 : vector<1x8x128xf32> to vector<8x128xf32>
    %73 = vector.shape_cast %69 : vector<8x128xf32> to vector<1x8x128xf32>
    tpu.vector_store %arg6[%70, %c0_32, %c0_33], %73 {strides = array<i32>} : memref<8x8x128xf32, #tpu.memory_space<vmem>>, vector<1x8x128xf32>,
    %c3_i32 = arith.constant 3 : i32
    %74 = arith.index_cast %c3_i32 : i32 to index
    %c0_34 = arith.constant 0 : index
    %c0_35 = arith.constant 0 : index
    %75 = vector.load %arg8[%74, %c0_34, %c0_35] : memref<8x8x256xf32, #tpu.memory_space<vmem>>, vector<1x8x256xf32>
    %76 = vector.shape_cast %75 : vector<1x8x256xf32> to vector<8x256xf32>
    %cst_36 = arith.constant dense<0.000000e+00> : vector<8x256xf32>
    %77 = tpu.matmul %58, %9, %cst_36 {dimension_numbers = #tpu.dot_dimension_numbers<[1], [0], [0], [1], [0, 0, 1, 1], [], []>} : vector<8x128xf32>, vector<128x256xf32>, vector<8x256xf32> -> vector<8x256xf32>
    %78 = arith.addf %76, %77 : vector<8x256xf32>
    %79 = vector.extract_strided_slice %78 {offsets = [0, 0], sizes = [8, 128], strides = [1, 1]} : vector<8x256xf32> to vector<8x128xf32>
    %80 = vector.extract_strided_slice %78 {offsets = [0, 128], sizes = [8, 128], strides = [1, 1]} : vector<8x256xf32> to vector<8x128xf32>
    %cst_37 = arith.constant dense<0xFF800000> : vector<8xf32>
    %81 = vector.multi_reduction <maximumf>, %80, %cst_37 [1] : vector<8x128xf32> to vector<8xf32>
    %82 = vector.shape_cast %81 : vector<8xf32> to vector<8x1xf32>
    %83 = vector.broadcast %82 : vector<8x1xf32> to vector<8x128xf32>
    %84 = arith.subf %80, %83 : vector<8x128xf32>
    %85 = math.exp %84 : vector<8x128xf32>
    %cst_38 = arith.constant dense<0.000000e+00> : vector<8xf32>
    %86 = vector.multi_reduction <add>, %85, %cst_38 [1] : vector<8x128xf32> to vector<8xf32>
    %87 = vector.shape_cast %86 : vector<8xf32> to vector<8x1xf32>
    %88 = math.log %87 : vector<8x1xf32>
    %89 = vector.broadcast %88 : vector<8x1xf32> to vector<8x128xf32>
    %90 = arith.subf %84, %89 : vector<8x128xf32>
    %91 = arith.index_cast %c3_i32 : i32 to index
    %c0_39 = arith.constant 0 : index
    %c0_40 = arith.constant 0 : index
    %92 = vector.load %arg6[%91, %c0_39, %c0_40] : memref<8x8x128xf32, #tpu.memory_space<vmem>>, vector<1x8x128xf32>
    %93 = vector.shape_cast %92 : vector<1x8x128xf32> to vector<8x128xf32>
    %94 = vector.shape_cast %90 : vector<8x128xf32> to vector<1x8x128xf32>
    tpu.vector_store %arg6[%91, %c0_39, %c0_40], %94 {strides = array<i32>} : memref<8x8x128xf32, #tpu.memory_space<vmem>>, vector<1x8x128xf32>,
    %c4_i32 = arith.constant 4 : i32
    %95 = arith.index_cast %c4_i32 : i32 to index
    %c0_41 = arith.constant 0 : index
    %c0_42 = arith.constant 0 : index
    %96 = vector.load %arg8[%95, %c0_41, %c0_42] : memref<8x8x256xf32, #tpu.memory_space<vmem>>, vector<1x8x256xf32>
    %97 = vector.shape_cast %96 : vector<1x8x256xf32> to vector<8x256xf32>
    %cst_43 = arith.constant dense<0.000000e+00> : vector<8x256xf32>
    %98 = tpu.matmul %79, %9, %cst_43 {dimension_numbers = #tpu.dot_dimension_numbers<[1], [0], [0], [1], [0, 0, 1, 1], [], []>} : vector<8x128xf32>, vector<128x256xf32>, vector<8x256xf32> -> vector<8x256xf32>
    %99 = arith.addf %97, %98 : vector<8x256xf32>
    %100 = vector.extract_strided_slice %99 {offsets = [0, 0], sizes = [8, 128], strides = [1, 1]} : vector<8x256xf32> to vector<8x128xf32>
    %101 = vector.extract_strided_slice %99 {offsets = [0, 128], sizes = [8, 128], strides = [1, 1]} : vector<8x256xf32> to vector<8x128xf32>
    %cst_44 = arith.constant dense<0xFF800000> : vector<8xf32>
    %102 = vector.multi_reduction <maximumf>, %101, %cst_44 [1] : vector<8x128xf32> to vector<8xf32>
    %103 = vector.shape_cast %102 : vector<8xf32> to vector<8x1xf32>
    %104 = vector.broadcast %103 : vector<8x1xf32> to vector<8x128xf32>
    %105 = arith.subf %101, %104 : vector<8x128xf32>
    %106 = math.exp %105 : vector<8x128xf32>
    %cst_45 = arith.constant dense<0.000000e+00> : vector<8xf32>
    %107 = vector.multi_reduction <add>, %106, %cst_45 [1] : vector<8x128xf32> to vector<8xf32>
    %108 = vector.shape_cast %107 : vector<8xf32> to vector<8x1xf32>
    %109 = math.log %108 : vector<8x1xf32>
    %110 = vector.broadcast %109 : vector<8x1xf32> to vector<8x128xf32>
    %111 = arith.subf %105, %110 : vector<8x128xf32>
    %112 = arith.index_cast %c4_i32 : i32 to index
    %c0_46 = arith.constant 0 : index
    %c0_47 = arith.constant 0 : index
    %113 = vector.load %arg6[%112, %c0_46, %c0_47] : memref<8x8x128xf32, #tpu.memory_space<vmem>>, vector<1x8x128xf32>
    %114 = vector.shape_cast %113 : vector<1x8x128xf32> to vector<8x128xf32>
    %115 = vector.shape_cast %111 : vector<8x128xf32> to vector<1x8x128xf32>
    tpu.vector_store %arg6[%112, %c0_46, %c0_47], %115 {strides = array<i32>} : memref<8x8x128xf32, #tpu.memory_space<vmem>>, vector<1x8x128xf32>,
    %c5_i32 = arith.constant 5 : i32
    %116 = arith.index_cast %c5_i32 : i32 to index
    %c0_48 = arith.constant 0 : index
    %c0_49 = arith.constant 0 : index
    %117 = vector.load %arg8[%116, %c0_48, %c0_49] : memref<8x8x256xf32, #tpu.memory_space<vmem>>, vector<1x8x256xf32>
    %118 = vector.shape_cast %117 : vector<1x8x256xf32> to vector<8x256xf32>
    %cst_50 = arith.constant dense<0.000000e+00> : vector<8x256xf32>
    %119 = tpu.matmul %100, %9, %cst_50 {dimension_numbers = #tpu.dot_dimension_numbers<[1], [0], [0], [1], [0, 0, 1, 1], [], []>} : vector<8x128xf32>, vector<128x256xf32>, vector<8x256xf32> -> vector<8x256xf32>
    %120 = arith.addf %118, %119 : vector<8x256xf32>
    %121 = vector.extract_strided_slice %120 {offsets = [0, 0], sizes = [8, 128], strides = [1, 1]} : vector<8x256xf32> to vector<8x128xf32>
    %122 = vector.extract_strided_slice %120 {offsets = [0, 128], sizes = [8, 128], strides = [1, 1]} : vector<8x256xf32> to vector<8x128xf32>
    %cst_51 = arith.constant dense<0xFF800000> : vector<8xf32>
    %123 = vector.multi_reduction <maximumf>, %122, %cst_51 [1] : vector<8x128xf32> to vector<8xf32>
    %124 = vector.shape_cast %123 : vector<8xf32> to vector<8x1xf32>
    %125 = vector.broadcast %124 : vector<8x1xf32> to vector<8x128xf32>
    %126 = arith.subf %122, %125 : vector<8x128xf32>
    %127 = math.exp %126 : vector<8x128xf32>
    %cst_52 = arith.constant dense<0.000000e+00> : vector<8xf32>
    %128 = vector.multi_reduction <add>, %127, %cst_52 [1] : vector<8x128xf32> to vector<8xf32>
    %129 = vector.shape_cast %128 : vector<8xf32> to vector<8x1xf32>
    %130 = math.log %129 : vector<8x1xf32>
    %131 = vector.broadcast %130 : vector<8x1xf32> to vector<8x128xf32>
    %132 = arith.subf %126, %131 : vector<8x128xf32>
    %133 = arith.index_cast %c5_i32 : i32 to index
    %c0_53 = arith.constant 0 : index
    %c0_54 = arith.constant 0 : index
    %134 = vector.load %arg6[%133, %c0_53, %c0_54] : memref<8x8x128xf32, #tpu.memory_space<vmem>>, vector<1x8x128xf32>
    %135 = vector.shape_cast %134 : vector<1x8x128xf32> to vector<8x128xf32>
    %136 = vector.shape_cast %132 : vector<8x128xf32> to vector<1x8x128xf32>
    tpu.vector_store %arg6[%133, %c0_53, %c0_54], %136 {strides = array<i32>} : memref<8x8x128xf32, #tpu.memory_space<vmem>>, vector<1x8x128xf32>,
    %c6_i32 = arith.constant 6 : i32
    %137 = arith.index_cast %c6_i32 : i32 to index
    %c0_55 = arith.constant 0 : index
    %c0_56 = arith.constant 0 : index
    %138 = vector.load %arg8[%137, %c0_55, %c0_56] : memref<8x8x256xf32, #tpu.memory_space<vmem>>, vector<1x8x256xf32>
    %139 = vector.shape_cast %138 : vector<1x8x256xf32> to vector<8x256xf32>
    %cst_57 = arith.constant dense<0.000000e+00> : vector<8x256xf32>
    %140 = tpu.matmul %121, %9, %cst_57 {dimension_numbers = #tpu.dot_dimension_numbers<[1], [0], [0], [1], [0, 0, 1, 1], [], []>} : vector<8x128xf32>, vector<128x256xf32>, vector<8x256xf32> -> vector<8x256xf32>
    %141 = arith.addf %139, %140 : vector<8x256xf32>
    %142 = vector.extract_strided_slice %141 {offsets = [0, 0], sizes = [8, 128], strides = [1, 1]} : vector<8x256xf32> to vector<8x128xf32>
    %143 = vector.extract_strided_slice %141 {offsets = [0, 128], sizes = [8, 128], strides = [1, 1]} : vector<8x256xf32> to vector<8x128xf32>
    %cst_58 = arith.constant dense<0xFF800000> : vector<8xf32>
    %144 = vector.multi_reduction <maximumf>, %143, %cst_58 [1] : vector<8x128xf32> to vector<8xf32>
    %145 = vector.shape_cast %144 : vector<8xf32> to vector<8x1xf32>
    %146 = vector.broadcast %145 : vector<8x1xf32> to vector<8x128xf32>
    %147 = arith.subf %143, %146 : vector<8x128xf32>
    %148 = math.exp %147 : vector<8x128xf32>
    %cst_59 = arith.constant dense<0.000000e+00> : vector<8xf32>
    %149 = vector.multi_reduction <add>, %148, %cst_59 [1] : vector<8x128xf32> to vector<8xf32>
    %150 = vector.shape_cast %149 : vector<8xf32> to vector<8x1xf32>
    %151 = math.log %150 : vector<8x1xf32>
    %152 = vector.broadcast %151 : vector<8x1xf32> to vector<8x128xf32>
    %153 = arith.subf %147, %152 : vector<8x128xf32>
    %154 = arith.index_cast %c6_i32 : i32 to index
    %c0_60 = arith.constant 0 : index
    %c0_61 = arith.constant 0 : index
    %155 = vector.load %arg6[%154, %c0_60, %c0_61] : memref<8x8x128xf32, #tpu.memory_space<vmem>>, vector<1x8x128xf32>
    %156 = vector.shape_cast %155 : vector<1x8x128xf32> to vector<8x128xf32>
    %157 = vector.shape_cast %153 : vector<8x128xf32> to vector<1x8x128xf32>
    tpu.vector_store %arg6[%154, %c0_60, %c0_61], %157 {strides = array<i32>} : memref<8x8x128xf32, #tpu.memory_space<vmem>>, vector<1x8x128xf32>,
    %c7_i32 = arith.constant 7 : i32
    %158 = arith.index_cast %c7_i32 : i32 to index
    %c0_62 = arith.constant 0 : index
    %c0_63 = arith.constant 0 : index
    %159 = vector.load %arg8[%158, %c0_62, %c0_63] : memref<8x8x256xf32, #tpu.memory_space<vmem>>, vector<1x8x256xf32>
    %160 = vector.shape_cast %159 : vector<1x8x256xf32> to vector<8x256xf32>
    %cst_64 = arith.constant dense<0.000000e+00> : vector<8x256xf32>
    %161 = tpu.matmul %142, %9, %cst_64 {dimension_numbers = #tpu.dot_dimension_numbers<[1], [0], [0], [1], [0, 0, 1, 1], [], []>} : vector<8x128xf32>, vector<128x256xf32>, vector<8x256xf32> -> vector<8x256xf32>
    %162 = arith.addf %160, %161 : vector<8x256xf32>
    %163 = vector.extract_strided_slice %162 {offsets = [0, 0], sizes = [8, 128], strides = [1, 1]} : vector<8x256xf32> to vector<8x128xf32>
    %164 = vector.extract_strided_slice %162 {offsets = [0, 128], sizes = [8, 128], strides = [1, 1]} : vector<8x256xf32> to vector<8x128xf32>
    %cst_65 = arith.constant dense<0xFF800000> : vector<8xf32>
    %165 = vector.multi_reduction <maximumf>, %164, %cst_65 [1] : vector<8x128xf32> to vector<8xf32>
    %166 = vector.shape_cast %165 : vector<8xf32> to vector<8x1xf32>
    %167 = vector.broadcast %166 : vector<8x1xf32> to vector<8x128xf32>
    %168 = arith.subf %164, %167 : vector<8x128xf32>
    %169 = math.exp %168 : vector<8x128xf32>
    %cst_66 = arith.constant dense<0.000000e+00> : vector<8xf32>
    %170 = vector.multi_reduction <add>, %169, %cst_66 [1] : vector<8x128xf32> to vector<8xf32>
    %171 = vector.shape_cast %170 : vector<8xf32> to vector<8x1xf32>
    %172 = math.log %171 : vector<8x1xf32>
    %173 = vector.broadcast %172 : vector<8x1xf32> to vector<8x128xf32>
    %174 = arith.subf %168, %173 : vector<8x128xf32>
    %175 = arith.index_cast %c7_i32 : i32 to index
    %c0_67 = arith.constant 0 : index
    %c0_68 = arith.constant 0 : index
    %176 = vector.load %arg6[%175, %c0_67, %c0_68] : memref<8x8x128xf32, #tpu.memory_space<vmem>>, vector<1x8x128xf32>
    %177 = vector.shape_cast %176 : vector<1x8x128xf32> to vector<8x128xf32>
    %178 = vector.shape_cast %174 : vector<8x128xf32> to vector<1x8x128xf32>
    tpu.vector_store %arg6[%175, %c0_67, %c0_68], %178 {strides = array<i32>} : memref<8x8x128xf32, #tpu.memory_space<vmem>>, vector<1x8x128xf32>,
    %c8_i32 = arith.constant 8 : i32
    %c0_69 = arith.constant 0 : index
    %c0_70 = arith.constant 0 : index
    %179 = vector.load %arg7[%c0_69, %c0_70] : memref<8x128xf32, #tpu.memory_space<vmem>>, vector<8x128xf32>
    tpu.vector_store %arg7[%c0_69, %c0_70], %163 {strides = array<i32>} : memref<8x128xf32, #tpu.memory_space<vmem>>, vector<8x128xf32>,
    return
  }
  func.func @transform_0(%arg0: i32) -> (i32, i32, i32) {
    %c0_i32 = arith.constant 0 : i32
    %c0_i32_0 = arith.constant 0 : i32
    %c0_i32_1 = arith.constant 0 : i32
    %c0_i32_2 = arith.constant 0 : i32
    return %c0_i32, %c0_i32_0, %c0_i32_1 : i32, i32, i32
  }
  func.func @transform_1(%arg0: i32) -> (i32, i32) {
    %c0_i32 = arith.constant 0 : i32
    %c0_i32_0 = arith.constant 0 : i32
    %c0_i32_1 = arith.constant 0 : i32
    return %c0_i32, %c0_i32_0 : i32, i32
  }
  func.func @transform_2(%arg0: i32) -> (i32, i32) {
    %c0_i32 = arith.constant 0 : i32
    %c0_i32_0 = arith.constant 0 : i32
    %c0_i32_1 = arith.constant 0 : i32
    return %c0_i32, %c0_i32_0 : i32, i32
  }
  func.func @transform_3(%arg0: i32) -> (i32, i32) {
    %c0_i32 = arith.constant 0 : i32
    %c0_i32_0 = arith.constant 0 : i32
    %c0_i32_1 = arith.constant 0 : i32
    return %c0_i32, %c0_i32_0 : i32, i32
  }
  func.func @transform_4(%arg0: i32) -> (i32, i32) {
    %c0_i32 = arith.constant 0 : i32
    %c0_i32_0 = arith.constant 0 : i32
    %c0_i32_1 = arith.constant 0 : i32
    return %c0_i32, %c0_i32_0 : i32, i32
  }
  func.func @transform_5(%arg0: i32) -> (i32, i32, i32) {
    %c0_i32 = arith.constant 0 : i32
    %c0_i32_0 = arith.constant 0 : i32
    %c0_i32_1 = arith.constant 0 : i32
    %c0_i32_2 = arith.constant 0 : i32
    return %c0_i32, %c0_i32_0, %c0_i32_1 : i32, i32, i32
  }
  func.func @transform_6(%arg0: i32) -> (i32, i32) {
    %c0_i32 = arith.constant 0 : i32
    %c0_i32_0 = arith.constant 0 : i32
    %c0_i32_1 = arith.constant 0 : i32
    return %c0_i32, %c0_i32_0 : i32, i32
  }
}

</mosaic_0001>

<bundles_post_ra>
// kernel: tpu_custom_call.1
= control target key start
LH: loop header
LB: loop body
LE: loop exit
PB: predicated region body
PF: predicated region fallthrough
CT: control target
= control target key end

     0   :  { %12 = vsyncpa [#allocation4], 0  ;;  %s1404_s0 = inlined_call_operand.hbm [shape: f32[8,8,128], index: 0, kind: input, shape index: {}]   ;;  %s1405_s1 = inlined_call_operand.hbm [shape: f32[128,256], index: 1, kind: input, shape index: {}]   ;;  %s1406_s2 = inlined_call_operand.hbm [shape: f32[128,256], index: 2, kind: input, shape index: {}]   ;;  %s1407_s3 = inlined_call_operand.vmem [shape: f32[1,256], index: 3, kind: input, shape index: {}]   ;;  %s1408_s4 = inlined_call_operand.hbm [shape: f32[8,128], index: 4, kind: input, shape index: {}]   ;;  %s1409_s5 = inlined_call_operand.hbm [shape: f32[8,8,128], index: 5, kind: output, shape index: {0}]   ;;  %s1410_s6 = inlined_call_operand.hbm [shape: f32[8,128], index: 6, kind: output, shape index: {1}]  }
   0x1   :  { %13 = vsyncpa [#allocation7], 0 }
   0x2   :  { %14 = vsyncpa [#allocation10], 0 }
   0x3   :  { %15 = vsyncpa [#allocation5], 0  ;;  %s34_s23 = sshll.u32 %s1405_s1, 4  ;;  %s35_s23 = int_to_ptr.hbm [resolvable:$true] %s34_s23 }
   0x4   :  { %16 = vsyncpa [#allocation13], 0  ;;  %s950_s24 = smov [#allocation6]   ;;  %s21_s28 = sshll.u32 %s1404_s0, 4  ;;  %s22_s28 = int_to_ptr.hbm [resolvable:$true] %s21_s28 }
   0x5   :  { %s36_s25 = sshll.u32 %s950_s24, 4  ;;  %s951_s29 = smov 256   ;;  %s37_s25 = int_to_ptr.vmem [resolvable:$true] %s36_s25 }
   0x6   :  { %s952_s30 = smov 16   ;;  %s953_s7 = smov [#allocation3]  }
   0x7   :  { %42 = dma.hbm_to_vmem [thread:$0]  %s35_s23, 4096, %s37_s25, [#allocation7], %s951_s29, %s951_s29, %s952_s30  }
   0x8   :  { %s23_s8 = sshll.u32 %s953_s7, 4  ;;  %s954_s9 = smov 128   ;;  %s24_s8 = int_to_ptr.vmem [resolvable:$true] %s23_s8 }
   0x9   :  { %s955_s10 = smov 8   ;;  %s47_s12 = sshll.u32 %s1406_s2, 4  ;;  %s48_s12 = int_to_ptr.hbm [resolvable:$true] %s47_s12 }
   0xa   :  { %29 = dma.hbm_to_vmem [thread:$0]  %s22_s28, 1024, %s24_s8, [#allocation4], %s954_s9, %s954_s9, %s955_s10  }
   0xb   :  { %s956_s13 = smov [#allocation8]   ;;  %s63_s16 = sshll.u32 %s1408_s4, 4  ;;  %s64_s16 = int_to_ptr.hbm [resolvable:$true] %s63_s16 }
   0xc   :  { %s49_s0 = sshll.u32 %s956_s13, 4  ;;  %s957_s17 = smov [#allocation9]   ;;  %s50_s0 = int_to_ptr.vmem [resolvable:$true] %s49_s0 }
   0xd   :  { %55 = dma.hbm_to_vmem [thread:$0]  %s48_s12, 4096, %s50_s0, [#allocation7], %s951_s29, %s951_s29, %s952_s30  }
   0xe   :  { %s65_s18 = sshll.u32 %s957_s17, 4  ;;  %s66_s18 = int_to_ptr.vmem [resolvable:$true] %s65_s18 }
   0xf   :  { %68 = dma.hbm_to_vmem [thread:$0]  %s64_s16, 128, %s66_s18, [#allocation10]  }
  0x10   :  { %940 = dma.done.wait [#allocation4], 1024  }
  0x11   :  { %941 = vsyncadd [#allocation4], 4294966272 }
  0x12   :  { %942 = dma.done.wait [#allocation7], 8192  }
  0x13   :  { %943 = vsyncadd [#allocation7], 4294959104 }
  0x14   :  { %944 = dma.done.wait [#allocation10], 128  }
  0x15   :  { %945 = vsyncadd [#allocation10], 4294967168  ;;  %v1010_v0 = vld [vmem:[#allocation8 + $0xf0] sm:$0xff]  ;;  %v1012_v1 = vld [vmem:[#allocation8 + $0xe0] sm:$0xff]  ;;  %s737_s22 = sshll.u32 %s1410_s6, 4  ;;  %s959_s23 = smov [#allocation11]   ;;  %s738_s22 = int_to_ptr.hbm [resolvable:$true] %s737_s22 }
  0x16   :  { %v123_v2 = vld [vmem:[#allocation6 + $0xf0] sm:$0xff]  ;;  %264 = vmatpush.msra.mxu2 %v1010_v0  ;;  %v121_v3 = vld [vmem:[#allocation6 + $0xe0] sm:$0xff]  ;;  %v1030_v14 = vld [vmem:[#allocation8 + $0xf8] sm:$0xff]  ;;  %s721_s24 = sshll.u32 %s959_s23, 4  ;;  %s723_s26 = sshll.u32 %s1409_s5, 4  ;;  %s722_s24 = int_to_ptr.vmem [resolvable:$true] %s721_s24  ;;  %s724_s26 = int_to_ptr.hbm [resolvable:$true] %s723_s26 }
  0x17   :  { %131 = vmatpush.msra.mxu0 %v123_v2  ;;  %v1015_v4 = vld [vmem:[#allocation8 + $0xd0] sm:$0xff]  ;;  %v1018_v6 = vld [vmem:[#allocation8 + $0xc0] sm:$0xff]  ;;  %v1032_v15 = vld [vmem:[#allocation8 + $0xe8] sm:$0xff]  ;;  %284 = vmatpush.msra.mxu3 %v1030_v14 }
  0x18   :  { %v119_v5 = vld [vmem:[#allocation6 + $0xd0] sm:$0xff]  ;;  %265 = vmatpush.msra.mxu2 %v1012_v1  ;;  %v117_v7 = vld [vmem:[#allocation6 + $0xc0] sm:$0xff]  ;;  %v1038_v18 = vld [vmem:[#allocation8 + $0xd8] sm:$0xff] }
  0x19   :  { %132 = vmatpush.msra.mxu0 %v121_v3  ;;  %v1021_v8 = vld [vmem:[#allocation8 + $0xb0] sm:$0xff]  ;;  %v1024_v10 = vld [vmem:[#allocation8 + $0xa0] sm:$0xff]  ;;  %285 = vmatpush.msra.mxu3 %v1032_v15  ;;  %v1044_v21 = vld [vmem:[#allocation8 + $0xc8] sm:$0xff] }
  0x1a   :  { %266 = vmatpush.msra.mxu2 %v1015_v4  ;;  %v115_v9 = vld [vmem:[#allocation6 + $0xb0] sm:$0xff]  ;;  %v113_v11 = vld [vmem:[#allocation6 + $0xa0] sm:$0xff]  ;;  %v124_v24 = vld [vmem:[#allocation6 + $0xf8] sm:$0xff] }
  0x1b   :  { %133 = vmatpush.msra.mxu0 %v119_v5  ;;  %v1027_v12 = vld [vmem:[#allocation8 + $0x90] sm:$0xff]  ;;  %v1034_v16 = vld [vmem:[#allocation8 + $0x80] sm:$0xff]  ;;  %286 = vmatpush.msra.mxu3 %v1038_v18  ;;  %v1050_v25 = vld [vmem:[#allocation8 + $0xb8] sm:$0xff] }
  0x1c   :  { %267 = vmatpush.msra.mxu2 %v1018_v6  ;;  %v111_v13 = vld [vmem:[#allocation6 + $0x90] sm:$0xff]  ;;  %v109_v17 = vld [vmem:[#allocation6 + $0x80] sm:$0xff]  ;;  %v122_v26 = vld [vmem:[#allocation6 + $0xe8] sm:$0xff]  ;;  %172 = vmatpush.msra.mxu1 %v124_v24 }
  0x1d   :  { %134 = vmatpush.msra.mxu0 %v117_v7  ;;  %v1040_v19 = vld [vmem:[#allocation8 + $0x70] sm:$0xff]  ;;  %v1046_v22 = vld [vmem:[#allocation8 + $0x60] sm:$0xff]  ;;  %287 = vmatpush.msra.mxu3 %v1044_v21  ;;  %v1056_v29 = vld [vmem:[#allocation8 + $0xa8] sm:$0xff] }
  0x1e   :  { %268 = vmatpush.msra.mxu2 %v1021_v8  ;;  %v107_v20 = vld [vmem:[#allocation6 + $0x70] sm:$0xff]  ;;  %v105_v23 = vld [vmem:[#allocation6 + $0x60] sm:$0xff]  ;;  %v120_v30 = vld [vmem:[#allocation6 + $0xd8] sm:$0xff]  ;;  %173 = vmatpush.msra.mxu1 %v122_v26 }
  0x1f   :  { %135 = vmatpush.msra.mxu0 %v115_v9  ;;  %v1052_v27 = vld [vmem:[#allocation8 + $0x50] sm:$0xff]  ;;  %v1058_v31 = vld [vmem:[#allocation8 + $0x40] sm:$0xff]  ;;  %288 = vmatpush.msra.mxu3 %v1050_v25  ;;  %v1062_v33 = vld [vmem:[#allocation8 + $0x98] sm:$0xff] }
  0x20   :  { %269 = vmatpush.msra.mxu2 %v1024_v10  ;;  %v103_v28 = vld [vmem:[#allocation6 + $0x50] sm:$0xff]  ;;  %v101_v32 = vld [vmem:[#allocation6 + $0x40] sm:$0xff]  ;;  %v118_v34 = vld [vmem:[#allocation6 + $0xc8] sm:$0xff]  ;;  %174 = vmatpush.msra.mxu1 %v120_v30 }
  0x21   :  { %136 = vmatpush.msra.mxu0 %v113_v11  ;;  %v1064_v35 = vld [vmem:[#allocation8 + $0x30] sm:$0xff]  ;;  %289 = vmatpush.msra.mxu3 %v1056_v29  ;;  %v1068_v37 = vld [vmem:[#allocation8 + $0x88] sm:$0xff]  ;;  %v116_v38 = vld [vmem:[#allocation6 + $0xb8] sm:$0xff] }
  0x22   :  { %270 = vmatpush.msra.mxu2 %v1027_v12  ;;  %v99_v36 = vld [vmem:[#allocation6 + $0x30] sm:$0xff]  ;;  %v1070_v39 = vld [vmem:[#allocation8 + $0x20] sm:$0xff]  ;;  %175 = vmatpush.msra.mxu1 %v118_v34  ;;  %v1074_v41 = vld [vmem:[#allocation8 + $0x78] sm:$0xff] }
  0x23   :  { %137 = vmatpush.msra.mxu0 %v111_v13  ;;  %v97_v40 = vld [vmem:[#allocation6 + $0x20] sm:$0xff]  ;;  %290 = vmatpush.msra.mxu3 %v1062_v33  ;;  %v114_v42 = vld [vmem:[#allocation6 + $0xa8] sm:$0xff]  ;;  %v1076_v43 = vld [vmem:[#allocation8 + $0x10] sm:$0xff] }
  0x24   :  { %271 = vmatpush.msra.mxu2 %v1034_v16  ;;  %v95_v44 = vld [vmem:[#allocation6 + $0x10] sm:$0xff]  ;;  %176 = vmatpush.msra.mxu1 %v116_v38  ;;  %v1080_v45 = vld [vmem:[#allocation8 + $0x68] sm:$0xff]  ;;  %v112_v46 = vld [vmem:[#allocation6 + $0x98] sm:$0xff] }
  0x25   :  { %138 = vmatpush.msra.mxu0 %v109_v17  ;;  %291 = vmatpush.msra.mxu3 %v1068_v37  ;;  %v1082_v47 = vld [vmem:[#allocation8] sm:$0xff]  ;;  %v1089_v51 = vld [vmem:[#allocation8 + $0x58] sm:$0xff]  ;;  %v110_v52 = vld [vmem:[#allocation6 + $0x88] sm:$0xff] }
  0x26   :  { %272 = vmatpush.msra.mxu2 %v1040_v19  ;;  %v93_v48 = vld [vmem:[#allocation6] sm:$0xff]  ;;  %177 = vmatpush.msra.mxu1 %v114_v42  ;;  %v1093_v53 = vld [vmem:[#allocation8 + $0x48] sm:$0xff]  ;;  %v108_v54 = vld [vmem:[#allocation6 + $0x78] sm:$0xff] }
  0x27   :  { %139 = vmatpush.msra.mxu0 %v107_v20  ;;  %292 = vmatpush.msra.mxu3 %v1074_v41  ;;  %v261_v49 = vld [vmem:[#allocation9] sm:$0xff]  ;;  %v1097_v55 = vld [vmem:[#allocation8 + $0x38] sm:$0xff]  ;;  %v106_v56 = vld [vmem:[#allocation6 + $0x68] sm:$0xff] }
  0x28   :  { %273 = vmatpush.msra.mxu2 %v1046_v22  ;;  %v1086_v50 = vld [vmem:[#allocation3] sm:$0xff]  ;;  %178 = vmatpush.msra.mxu1 %v112_v46  ;;  %v1102_v57 = vld [vmem:[#allocation8 + $0x28] sm:$0xff]  ;;  %v104_v58 = vld [vmem:[#allocation6 + $0x58] sm:$0xff] }
  0x29   :  { %140 = vmatpush.msra.mxu0 %v105_v23  ;;  %293 = vmatpush.msra.mxu3 %v1080_v45  ;;  %v1107_v59 = vld [vmem:[#allocation8 + $0x18] sm:$0xff]  ;;  %v102_v60 = vld [vmem:[#allocation6 + $0x48] sm:$0xff]  ;;  %v87_v7 = vld [vmem:[#allocation3 + $0x10] sm:$0xff] }
  0x2a   :  { %274 = vmatpush.msra.mxu2 %v1052_v27  ;;  %179 = vmatpush.msra.mxu1 %v110_v52  ;;  %v1112_v61 = vld [vmem:[#allocation8 + $0x8] sm:$0xff]  ;;  %v100_v62 = vld [vmem:[#allocation6 + $0x38] sm:$0xff]  ;;  %v1221_v11 = vld [vmem:[%s1407_s3] sm:$0x3]  ;;  %s958_s3 = smov [#allocation12]  }
  0x2b   :  { %141 = vmatpush.msra.mxu0 %v103_v28  ;;  %294 = vmatpush.msra.mxu3 %v1089_v51  ;;  %v98_v63 = vld [vmem:[#allocation6 + $0x28] sm:$0xff]  ;;  %v96_v2 = vld [vmem:[#allocation6 + $0x18] sm:$0xff]  ;;  %v1226_v13 = vperm.slane %v1221_v11, 0  ;;  %v89_v17 = vld [vmem:[#allocation3 + $0x20] sm:$0xff]  ;;  %v1280_v34 = vperm.slane %v1221_v11, 1  ;;  %s735_s19 = sshll.u32 %s958_s3, 4  ;;  %s736_s19 = int_to_ptr.vmem [resolvable:$true] %s735_s19 }
  0x2c   :  { %275 = vmatpush.msra.mxu2 %v1058_v31  ;;  %180 = vmatpush.msra.mxu1 %v108_v54  ;;  %v94_v3 = vld [vmem:[#allocation6 + $0x8] sm:$0xff]  ;;  %v88_v9 = vld [vmem:[#allocation3 + $0x18] sm:$0xff]  ;;  %v91_v30 = vld [vmem:[#allocation3 + $0x30] sm:$0xff] }
  0x2d   :  { %142 = vmatpush.msra.mxu0 %v101_v32  ;;  %295 = vmatpush.msra.mxu3 %v1093_v53  ;;  %v86_v5 = vld [vmem:[#allocation3 + $0x8] sm:$0xff]  ;;  %v92_v32 = vld [vmem:[#allocation3 + $0x38] sm:$0xff] }
  0x2e   :  { %276 = vmatpush.msra.mxu2 %v1064_v35  ;;  %181 = vmatpush.msra.mxu1 %v106_v56  ;;  %v90_v28 = vld [vmem:[#allocation3 + $0x28] sm:$0xff] }
  0x2f   :  { %143 = vmatpush.msra.mxu0 %v99_v36  ;;  %296 = vmatpush.msra.mxu3 %v1097_v55 }
  0x30   :  { %277 = vmatpush.msra.mxu2 %v1070_v39  ;;  %182 = vmatpush.msra.mxu1 %v104_v58 }
  0x31   :  { %144 = vmatpush.msra.mxu0 %v97_v40  ;;  %297 = vmatpush.msra.mxu3 %v1102_v57 }
  0x32   :  { %278 = vmatpush.msra.mxu2 %v1076_v43  ;;  %183 = vmatpush.msra.mxu1 %v102_v60 }
  0x33   :  { %145 = vmatpush.msra.mxu0 %v95_v44  ;;  %298 = vmatpush.msra.mxu3 %v1107_v59 }
  0x34   :  { %279 = vmatpush.msra.mxu2 %v1082_v47  ;;  %184 = vmatpush.msra.mxu1 %v100_v62 }
  0x35   :  { %146 = vmatpush.msra.mxu0 %v93_v48  ;;  %280 = vmatmul.f32.vlgmr.msra.gmra.mxu2 %v261_v49 }
  0x36   :  { %147 = vmatmul.f32.vlgmr.msra.gmra.mxu0 %v1086_v50  ;;  %320 = vmatpush.msrb.mxu2 %v1010_v0 }
  0x37   :  { %377 = vmatpush.msrb.mxu0 %v1010_v0  ;;  %299 = vmatpush.msra.mxu3 %v1112_v61 }
  0x38   :  { %321 = vmatpush.msrb.mxu2 %v1012_v1  ;;  %300 = vmatmul.f32.vlgmr.msra.gmra.mxu3 %v261_v49 }
  0x39   :  { %378 = vmatpush.msrb.mxu0 %v1012_v1  ;;  %340 = vmatpush.msrb.mxu3 %v1030_v14 }
  0x3a   :  { %322 = vmatpush.msrb.mxu2 %v1015_v4  ;;  %185 = vmatpush.msra.mxu1 %v98_v63 }
  0x3b   :  { %379 = vmatpush.msrb.mxu0 %v1015_v4  ;;  %341 = vmatpush.msrb.mxu3 %v1032_v15 }
  0x3c   :  { %323 = vmatpush.msrb.mxu2 %v1018_v6  ;;  %186 = vmatpush.msra.mxu1 %v96_v2 }
  0x3d   :  { %380 = vmatpush.msrb.mxu0 %v1018_v6  ;;  %342 = vmatpush.msrb.mxu3 %v1038_v18 }
  0x3e   :  { %324 = vmatpush.msrb.mxu2 %v1021_v8  ;;  %187 = vmatpush.msra.mxu1 %v94_v3 }
  0x3f   :  { %381 = vmatpush.msrb.mxu0 %v1021_v8  ;;  %343 = vmatpush.msrb.mxu3 %v1044_v21 }
  0x40   :  { %325 = vmatpush.msrb.mxu2 %v1024_v10  ;;  %188 = vmatmul.f32.vlgmr.msra.gmra.mxu1 %v1086_v50 }
  0x41   :  { %382 = vmatpush.msrb.mxu0 %v1024_v10  ;;  %344 = vmatpush.msrb.mxu3 %v1050_v25 }
  0x42   :  { %326 = vmatpush.msrb.mxu2 %v1027_v12  ;;  %397 = vmatpush.msrb.mxu1 %v1030_v14 }
  0x43   :  { %383 = vmatpush.msrb.mxu0 %v1027_v12  ;;  %345 = vmatpush.msrb.mxu3 %v1056_v29 }
  0x44   :  { %327 = vmatpush.msrb.mxu2 %v1034_v16  ;;  %398 = vmatpush.msrb.mxu1 %v1032_v15 }
  0x45   :  { %384 = vmatpush.msrb.mxu0 %v1034_v16  ;;  %346 = vmatpush.msrb.mxu3 %v1062_v33 }
  0x46   :  { %328 = vmatpush.msrb.mxu2 %v1040_v19  ;;  %399 = vmatpush.msrb.mxu1 %v1038_v18 }
  0x47   :  { %385 = vmatpush.msrb.mxu0 %v1040_v19  ;;  %347 = vmatpush.msrb.mxu3 %v1068_v37 }
  0x48   :  { %329 = vmatpush.msrb.mxu2 %v1046_v22  ;;  %150 = vmatmul.f32.gmra.mxu0 %v86_v5 }
  0x49   :  { %386 = vmatpush.msrb.mxu0 %v1046_v22  ;;  %348 = vmatpush.msrb.mxu3 %v1074_v41 }
  0x4a   :  { %330 = vmatpush.msrb.mxu2 %v1052_v27  ;;  %400 = vmatpush.msrb.mxu1 %v1044_v21 }
  0x4b   :  { %387 = vmatpush.msrb.mxu0 %v1052_v27  ;;  %349 = vmatpush.msrb.mxu3 %v1080_v45 }
  0x4c   :  { %331 = vmatpush.msrb.mxu2 %v1058_v31  ;;  %191 = vmatmul.f32.gmra.mxu1 %v86_v5 }
  0x4d   :  { %388 = vmatpush.msrb.mxu0 %v1058_v31  ;;  %350 = vmatpush.msrb.mxu3 %v1089_v51 }
  0x4e   :  { %332 = vmatpush.msrb.mxu2 %v1064_v35  ;;  %401 = vmatpush.msrb.mxu1 %v1050_v25 }
  0x4f   :  { %389 = vmatpush.msrb.mxu0 %v1064_v35  ;;  %351 = vmatpush.msrb.mxu3 %v1093_v53 }
  0x50   :  { %333 = vmatpush.msrb.mxu2 %v1070_v39  ;;  %402 = vmatpush.msrb.mxu1 %v1056_v29 }
  0x51   :  { %390 = vmatpush.msrb.mxu0 %v1070_v39  ;;  %352 = vmatpush.msrb.mxu3 %v1097_v55 }
  0x52   :  { %334 = vmatpush.msrb.mxu2 %v1076_v43  ;;  %403 = vmatpush.msrb.mxu1 %v1062_v33 }
  0x53   :  { %391 = vmatpush.msrb.mxu0 %v1076_v43  ;;  %353 = vmatpush.msrb.mxu3 %v1102_v57 }
  0x54   :  { %335 = vmatpush.msrb.mxu2 %v1082_v47  ;;  %153 = vmatmul.f32.gmra.mxu0 %v87_v7 }
  0x55   :  { %392 = vmatpush.msrb.mxu0 %v1082_v47  ;;  %354 = vmatpush.msrb.mxu3 %v1107_v59 }
  0x56   :  { %434 = vmatpush.msra.mxu2 %v1010_v0  ;;  %404 = vmatpush.msrb.mxu1 %v1068_v37 }
  0x57   :  { %491 = vmatpush.msra.mxu0 %v1010_v0  ;;  %355 = vmatpush.msrb.mxu3 %v1112_v61 }
  0x58   :  { %435 = vmatpush.msra.mxu2 %v1012_v1  ;;  %194 = vmatmul.f32.gmra.mxu1 %v87_v7 }
  0x59   :  { %492 = vmatpush.msra.mxu0 %v1012_v1  ;;  %454 = vmatpush.msra.mxu3 %v1030_v14 }
  0x5a   :  { %436 = vmatpush.msra.mxu2 %v1015_v4  ;;  %405 = vmatpush.msrb.mxu1 %v1074_v41 }
  0x5b   :  { %493 = vmatpush.msra.mxu0 %v1015_v4  ;;  %455 = vmatpush.msra.mxu3 %v1032_v15 }
  0x5c   :  { %437 = vmatpush.msra.mxu2 %v1018_v6  ;;  %406 = vmatpush.msrb.mxu1 %v1080_v45 }
  0x5d   :  { %494 = vmatpush.msra.mxu0 %v1018_v6  ;;  %456 = vmatpush.msra.mxu3 %v1038_v18 }
  0x5e   :  { %438 = vmatpush.msra.mxu2 %v1021_v8  ;;  %407 = vmatpush.msrb.mxu1 %v1089_v51 }
  0x5f   :  { %495 = vmatpush.msra.mxu0 %v1021_v8  ;;  %457 = vmatpush.msra.mxu3 %v1044_v21 }
  0x60   :  { %439 = vmatpush.msra.mxu2 %v1024_v10  ;;  %156 = vmatmul.f32.gmra.mxu0 %v88_v9 }
  0x61   :  { %496 = vmatpush.msra.mxu0 %v1024_v10  ;;  %458 = vmatpush.msra.mxu3 %v1050_v25 }
  0x62   :  { %440 = vmatpush.msra.mxu2 %v1027_v12  ;;  %408 = vmatpush.msrb.mxu1 %v1093_v53 }
  0x63   :  { %497 = vmatpush.msra.mxu0 %v1027_v12  ;;  %459 = vmatpush.msra.mxu3 %v1056_v29 }
  0x64   :  { %441 = vmatpush.msra.mxu2 %v1034_v16  ;;  %197 = vmatmul.f32.gmra.mxu1 %v88_v9 }
  0x65   :  { %498 = vmatpush.msra.mxu0 %v1034_v16  ;;  %460 = vmatpush.msra.mxu3 %v1062_v33 }
  0x66   :  { %442 = vmatpush.msra.mxu2 %v1040_v19  ;;  %409 = vmatpush.msrb.mxu1 %v1097_v55 }
  0x67   :  { %499 = vmatpush.msra.mxu0 %v1040_v19  ;;  %461 = vmatpush.msra.mxu3 %v1068_v37 }
  0x68   :  { %443 = vmatpush.msra.mxu2 %v1046_v22  ;;  %410 = vmatpush.msrb.mxu1 %v1102_v57 }
  0x69   :  { %500 = vmatpush.msra.mxu0 %v1046_v22  ;;  %462 = vmatpush.msra.mxu3 %v1074_v41 }
  0x6a   :  { %444 = vmatpush.msra.mxu2 %v1052_v27  ;;  %411 = vmatpush.msrb.mxu1 %v1107_v59 }
  0x6b   :  { %501 = vmatpush.msra.mxu0 %v1052_v27  ;;  %463 = vmatpush.msra.mxu3 %v1080_v45 }
  0x6c   :  { %445 = vmatpush.msra.mxu2 %v1058_v31  ;;  %159 = vmatmul.f32.gmra.mxu0 %v89_v17 }
  0x6d   :  { %502 = vmatpush.msra.mxu0 %v1058_v31  ;;  %464 = vmatpush.msra.mxu3 %v1089_v51 }
  0x6e   :  { %446 = vmatpush.msra.mxu2 %v1064_v35  ;;  %412 = vmatpush.msrb.mxu1 %v1112_v61 }
  0x6f   :  { %503 = vmatpush.msra.mxu0 %v1064_v35  ;;  %465 = vmatpush.msra.mxu3 %v1093_v53 }
  0x70   :  { %447 = vmatpush.msra.mxu2 %v1070_v39  ;;  %200 = vmatmul.f32.gmra.mxu1 %v89_v17 }
  0x71   :  { %504 = vmatpush.msra.mxu0 %v1070_v39  ;;  %466 = vmatpush.msra.mxu3 %v1097_v55 }
  0x72   :  { %448 = vmatpush.msra.mxu2 %v1076_v43  ;;  %511 = vmatpush.msra.mxu1 %v1030_v14 }
  0x73   :  { %505 = vmatpush.msra.mxu0 %v1076_v43  ;;  %467 = vmatpush.msra.mxu3 %v1102_v57 }
  0x74   :  { %449 = vmatpush.msra.mxu2 %v1082_v47  ;;  %512 = vmatpush.msra.mxu1 %v1032_v15 }
  0x75   :  { %506 = vmatpush.msra.mxu0 %v1082_v47  ;;  %468 = vmatpush.msra.mxu3 %v1107_v59 }
  0x76   :  { %513 = vmatpush.msra.mxu1 %v1038_v18  ;;  %162 = vmatmul.f32.gmra.mxu0 %v90_v28 }
  0x77   :  { %469 = vmatpush.msra.mxu3 %v1112_v61 }
  0x78   :  { %514 = vmatpush.msra.mxu1 %v1044_v21 }
  0x79   :  { %203 = vmatmul.f32.gmra.mxu1 %v90_v28 }
  0x7a   :  { %515 = vmatpush.msra.mxu1 %v1050_v25 }
  0x7c   :  { %516 = vmatpush.msra.mxu1 %v1056_v29 }
  0x7e   :  { %517 = vmatpush.msra.mxu1 %v1062_v33  ;;  %165 = vmatmul.f32.gmra.mxu0 %v91_v30 }
  0x80   :  { %518 = vmatpush.msra.mxu1 %v1068_v37 }
  0x81   :  { %206 = vmatmul.f32.gmra.mxu1 %v91_v30 }
  0x82   :  { %519 = vmatpush.msra.mxu1 %v1074_v41 }
  0x84   :  { %520 = vmatpush.msra.mxu1 %v1080_v45 }
  0x86   :  { %521 = vmatpush.msra.mxu1 %v1089_v51  ;;  %168 = vmatmul.f32.gmra.mxu0 %v92_v32 }
  0x88   :  { %522 = vmatpush.msra.mxu1 %v1093_v53 }
  0x89   :  { %209 = vmatmul.f32.gmra.mxu1 %v92_v32 }
  0x8a   :  { %523 = vmatpush.msra.mxu1 %v1097_v55 }
  0x8c   :  { %524 = vmatpush.msra.mxu1 %v1102_v57 }
  0x8e   :  { %525 = vmatpush.msra.mxu1 %v1107_v59 }
  0x90   :  { %526 = vmatpush.msra.mxu1 %v1112_v61 }
  0xb3   :  { %v148_v20 = vpop.f32.mrf.mxu0 }
  0xb4   :  { %v149_v23 = vadd.f32 %v148_v20, %v1226_v13 }
  0xb8   :  { %v281_v24 = vpop.f32.mrf.mxu2 }
  0xb9   :  { %v304_v26 = vadd.f32 %v281_v24, %v149_v23 }
  0xbb   :  { %336 = vmatmul.f32.vlgmr.msrb.gmra.mxu2 %v304_v26  ;;  %356 = vmatmul.f32.vlgmr.msrb.gmra.mxu3 %v304_v26  ;;  %v301_v38 = vpop.f32.mrf.mxu3 }
  0xbc   :  { %548 = vmatpush.msrb.mxu2 %v1010_v0  ;;  %568 = vmatpush.msrb.mxu3 %v1030_v14 }
  0xbd   :  { %v189_v36 = vpop.f32.mrf.mxu1 }
  0xbe   :  { %549 = vmatpush.msrb.mxu2 %v1012_v1  ;;  %569 = vmatpush.msrb.mxu3 %v1032_v15  ;;  %v190_v40 = vadd.f32 %v189_v36, %v1280_v34 }
  0xc0   :  { %550 = vmatpush.msrb.mxu2 %v1015_v4  ;;  %570 = vmatpush.msrb.mxu3 %v1038_v18  ;;  %v1283_v42 = vadd.f32 %v301_v38, %v190_v40 }
  0xc2   :  { %551 = vmatpush.msrb.mxu2 %v1018_v6  ;;  %571 = vmatpush.msrb.mxu3 %v1044_v21 }
  0xc3   :  { %306 = vmax.xlane.f32.xlu0 %v1283_v42 }
  0xc4   :  { %552 = vmatpush.msrb.mxu2 %v1021_v8  ;;  %572 = vmatpush.msrb.mxu3 %v1050_v25 }
  0xc5   :  { %v151_v44 = vpop.f32.mrf.mxu0 }
  0xc6   :  { %553 = vmatpush.msrb.mxu2 %v1024_v10  ;;  %573 = vmatpush.msrb.mxu3 %v1056_v29  ;;  %v152_v48 = vadd.f32 %v151_v44, %v1226_v13 }
  0xc8   :  { %554 = vmatpush.msrb.mxu2 %v1027_v12  ;;  %574 = vmatpush.msrb.mxu3 %v1062_v33 }
  0xc9   :  { %v192_v46 = vpop.f32.mrf.mxu1 }
  0xca   :  { %555 = vmatpush.msrb.mxu2 %v1034_v16  ;;  %575 = vmatpush.msrb.mxu3 %v1068_v37  ;;  %v193_v49 = vadd.f32 %v192_v46, %v1280_v34 }
  0xcc   :  { %556 = vmatpush.msrb.mxu2 %v1040_v19  ;;  %576 = vmatpush.msrb.mxu3 %v1074_v41 }
  0xce   :  { %557 = vmatpush.msrb.mxu2 %v1046_v22  ;;  %577 = vmatpush.msrb.mxu3 %v1080_v45 }
  0xd0   :  { %558 = vmatpush.msrb.mxu2 %v1052_v27  ;;  %578 = vmatpush.msrb.mxu3 %v1089_v51 }
  0xd1   :  { %v154_v58 = vpop.f32.mrf.mxu0 }
  0xd2   :  { %559 = vmatpush.msrb.mxu2 %v1058_v31  ;;  %579 = vmatpush.msrb.mxu3 %v1093_v53  ;;  %v155_v24 = vadd.f32 %v154_v58, %v1226_v13 }
  0xd4   :  { %560 = vmatpush.msrb.mxu2 %v1064_v35  ;;  %580 = vmatpush.msrb.mxu3 %v1097_v55 }
  0xd5   :  { %v195_v60 = vpop.f32.mrf.mxu1 }
  0xd6   :  { %561 = vmatpush.msrb.mxu2 %v1070_v39  ;;  %581 = vmatpush.msrb.mxu3 %v1102_v57  ;;  %v196_v23 = vadd.f32 %v195_v60, %v1280_v34 }
  0xd8   :  { %562 = vmatpush.msrb.mxu2 %v1076_v43  ;;  %582 = vmatpush.msrb.mxu3 %v1107_v59 }
  0xda   :  { %563 = vmatpush.msrb.mxu2 %v1082_v47  ;;  %583 = vmatpush.msrb.mxu3 %v1112_v61 }
  0xdd   :  { %v157_v62 = vpop.f32.mrf.mxu0 }
  0xe1   :  { %v198_v63 = vpop.f32.mrf.mxu1 }
  0xe9   :  { %v160_v2 = vpop.f32.mrf.mxu0 }
  0xed   :  { %v201_v3 = vpop.f32.mrf.mxu1 }
  0xf3   :  { %v1323_v5 = vpop.f32.mrf.mxu0 }
  0xf6   :  { %v1325_v7 = vpop.f32.mrf.mxu1 }
  0xfb   :  { %v1327_v9 = vpop.f32.mrf.mxu0 }
  0xfc   :  { %v167_v38 = vadd.f32 %v1327_v9, %v1226_v13 }
  0xfe   :  { %v1329_v11 = vpop.f32.mrf.mxu1 }
 0x103   :  { %v1331_v17 = vpop.f32.mrf.mxu0 }
 0x106   :  { %v1333_v20 = vpop.f32.mrf.mxu1 }
 0x13e   :  { %v337_v50 = vpop.f32.mrf.mxu2  ;;  %v357_v52 = vpop.f32.mrf.mxu3 }
 0x13f   :  { %v360_v54 = vadd.f32 %v337_v50, %v152_v48  ;;  %v1288_v56 = vadd.f32 %v357_v52, %v193_v49 }
 0x141   :  { %362 = vmax.xlane.f32.xlu0 %v1288_v56  ;;  %393 = vmatmul.f32.vlgmr.msrb.gmra.mxu0 %v360_v54 }
 0x142   :  { %413 = vmatmul.f32.vlgmr.msrb.gmra.mxu1 %v360_v54  ;;  %605 = vmatpush.msrb.mxu0 %v1010_v0 }
 0x143   :  { %625 = vmatpush.msrb.mxu1 %v1030_v14 }
 0x144   :  { %606 = vmatpush.msrb.mxu0 %v1012_v1 }
 0x145   :  { %626 = vmatpush.msrb.mxu1 %v1032_v15 }
 0x146   :  { %607 = vmatpush.msrb.mxu0 %v1015_v4 }
 0x147   :  { %627 = vmatpush.msrb.mxu1 %v1038_v18 }
 0x148   :  { %608 = vmatpush.msrb.mxu0 %v1018_v6 }
 0x149   :  { %628 = vmatpush.msrb.mxu1 %v1044_v21 }
 0x14a   :  { %609 = vmatpush.msrb.mxu0 %v1021_v8 }
 0x14b   :  { %629 = vmatpush.msrb.mxu1 %v1050_v25 }
 0x14c   :  { %610 = vmatpush.msrb.mxu0 %v1024_v10 }
 0x14d   :  { %630 = vmatpush.msrb.mxu1 %v1056_v29 }
 0x14e   :  { %611 = vmatpush.msrb.mxu0 %v1027_v12 }
 0x14f   :  { %631 = vmatpush.msrb.mxu1 %v1062_v33 }
 0x150   :  { %612 = vmatpush.msrb.mxu0 %v1034_v16 }
 0x151   :  { %632 = vmatpush.msrb.mxu1 %v1068_v37 }
 0x152   :  { %613 = vmatpush.msrb.mxu0 %v1040_v19 }
 0x153   :  { %633 = vmatpush.msrb.mxu1 %v1074_v41 }
 0x154   :  { %614 = vmatpush.msrb.mxu0 %v1046_v22 }
 0x155   :  { %634 = vmatpush.msrb.mxu1 %v1080_v45 }
 0x156   :  { %615 = vmatpush.msrb.mxu0 %v1052_v27 }
 0x157   :  { %635 = vmatpush.msrb.mxu1 %v1089_v51 }
 0x158   :  { %616 = vmatpush.msrb.mxu0 %v1058_v31 }
 0x159   :  { %636 = vmatpush.msrb.mxu1 %v1093_v53 }
 0x15a   :  { %617 = vmatpush.msrb.mxu0 %v1064_v35 }
 0x15b   :  { %637 = vmatpush.msrb.mxu1 %v1097_v55 }
 0x15c   :  { %618 = vmatpush.msrb.mxu0 %v1070_v39 }
 0x15d   :  { %638 = vmatpush.msrb.mxu1 %v1102_v57 }
 0x15e   :  { %619 = vmatpush.msrb.mxu0 %v1076_v43 }
 0x15f   :  { %639 = vmatpush.msrb.mxu1 %v1107_v59 }
 0x160   :  { %620 = vmatpush.msrb.mxu0 %v1082_v47 }
 0x161   :  { %640 = vmatpush.msrb.mxu1 %v1112_v61 }
 0x1be   :  { %v394_v26 = vpop.f32.mrf.mxu0 }
 0x1bf   :  { %v417_v28 = vadd.f32 %v394_v26, %v155_v24  ;;  %v414_v30 = vpop.f32.mrf.mxu1  ;;  %v170_v26 = vadd.f32 %v1331_v17, %v1226_v13 }
 0x1c0   :  { %v1337_v32 = vadd.f32 %v414_v30, %v196_v23 }
 0x1c1   :  { %450 = vmatmul.f32.vlgmr.msra.gmra.mxu2 %v417_v28  ;;  %470 = vmatmul.f32.vlgmr.msra.gmra.mxu3 %v417_v28  ;;  %v211_v28 = vadd.f32 %v1333_v20, %v1280_v34 }
 0x1c2   :  { %419 = vmax.xlane.f32.xlu1 %v1337_v32  ;;  %662 = vmatpush.msra.mxu2 %v1010_v0  ;;  %v199_v0 = vadd.f32 %v198_v63, %v1280_v34 }
 0x1c3   :  { %682 = vmatpush.msra.mxu3 %v1030_v14  ;;  %v161_v14 = vadd.f32 %v160_v2, %v1226_v13 }
 0x1c4   :  { %663 = vmatpush.msra.mxu2 %v1012_v1  ;;  %v158_v1 = vadd.f32 %v157_v62, %v1226_v13 }
 0x1c5   :  { %683 = vmatpush.msra.mxu3 %v1032_v15 }
 0x1c6   :  { %664 = vmatpush.msra.mxu2 %v1015_v4 }
 0x1c7   :  { %684 = vmatpush.msra.mxu3 %v1038_v18 }
 0x1c8   :  { %665 = vmatpush.msra.mxu2 %v1018_v6 }
 0x1c9   :  { %685 = vmatpush.msra.mxu3 %v1044_v21  ;;  %v307_v21 = vpop.xlane.xlu0 %306 }
 0x1ca   :  { %666 = vmatpush.msra.mxu2 %v1021_v8 }
 0x1cb   :  { %686 = vmatpush.msra.mxu3 %v1050_v25  ;;  %v308_v25 = vsub.f32 %v1283_v42, %v307_v21 }
 0x1cc   :  { %667 = vmatpush.msra.mxu2 %v1024_v10 }
 0x1cd   :  { %687 = vmatpush.msra.mxu3 %v1056_v29  ;;  %v309_v29 = vmul.f32 1.442695, %v308_v25 }
 0x1ce   :  { %668 = vmatpush.msra.mxu2 %v1027_v12  ;;  %v202_v12 = vadd.f32 %v201_v3, %v1280_v34 }
 0x1cf   :  { %688 = vmatpush.msra.mxu3 %v1062_v33  ;;  %764 = vpow2.f32 %v309_v29 }
 0x1d0   :  { %669 = vmatpush.msra.mxu2 %v1034_v16 }
 0x1d1   :  { %689 = vmatpush.msra.mxu3 %v1068_v37 }
 0x1d2   :  { %670 = vmatpush.msra.mxu2 %v1040_v19 }
 0x1d3   :  { %690 = vmatpush.msra.mxu3 %v1074_v41 }
 0x1d4   :  { %671 = vmatpush.msra.mxu2 %v1046_v22 }
 0x1d5   :  { %691 = vmatpush.msra.mxu3 %v1080_v45  ;;  %v765_v45 = vpop.eup %764 }
 0x1d6   :  { %672 = vmatpush.msra.mxu2 %v1052_v27  ;;  %v205_v27 = vadd.f32 %v1325_v7, %v1280_v34 }
 0x1d7   :  { %692 = vmatpush.msra.mxu3 %v1089_v51 }
 0x1d8   :  { %673 = vmatpush.msra.mxu2 %v1058_v31  ;;  %v164_v31 = vadd.f32 %v1323_v5, %v1226_v13 }
 0x1d9   :  { %693 = vmatpush.msra.mxu3 %v1093_v53 }
 0x1da   :  { %674 = vmatpush.msra.mxu2 %v1064_v35 }
 0x1db   :  { %694 = vmatpush.msra.mxu3 %v1097_v55 }
 0x1dc   :  { %675 = vmatpush.msra.mxu2 %v1070_v39 }
 0x1dd   :  { %695 = vmatpush.msra.mxu3 %v1102_v57  ;;  %v363_v57 = vpop.xlane.xlu0 %362 }
 0x1de   :  { %676 = vmatpush.msra.mxu2 %v1076_v43 }
 0x1df   :  { %696 = vmatpush.msra.mxu3 %v1107_v59  ;;  %v364_v59 = vsub.f32 %v1288_v56, %v363_v57 }
 0x1e0   :  { %677 = vmatpush.msra.mxu2 %v1082_v47 }
 0x1e1   :  { %697 = vmatpush.msra.mxu3 %v1112_v61  ;;  %v208_v61 = vadd.f32 %v1329_v11, %v1280_v34  ;;  %v365_v42 = vmul.f32 1.442695, %v364_v59 }
 0x235   :  { %v420_v22 = vpop.xlane.xlu1 %419 }
 0x236   :  { %v421_v24 = vsub.f32 %v1337_v32, %v420_v22 }
 0x244   :  { %v451_v4 = vpop.f32.mrf.mxu2  ;;  %v471_v6 = vpop.f32.mrf.mxu3 }
 0x245   :  { %v474_v8 = vadd.f32 %v451_v4, %v158_v1  ;;  %v475_v10 = vadd.f32 %v471_v6, %v199_v0  ;;  %v422_v0 = vmul.f32 1.442695, %v421_v24 }
 0x247   :  { %476 = vmax.xlane.f32.xlu1 %v475_v10  ;;  %507 = vmatmul.f32.vlgmr.msra.gmra.mxu0 %v474_v8 }
 0x248   :  { %527 = vmatmul.f32.vlgmr.msra.gmra.mxu1 %v474_v8 }
 0x2ba   :  { %v477_v37 = vpop.xlane.xlu1 %476 }
 0x2bb   :  { %v478_v43 = vsub.f32 %v475_v10, %v477_v37 }
 0x2bd   :  { %v479_v47 = vmul.f32 1.442695, %v478_v43 }
 0x2bf   :  { %766 = vpow2.f32 %v479_v47 }
 0x2c4   :  { %v508_v15 = vpop.f32.mrf.mxu0 }
 0x2c5   :  { %v531_v16 = vadd.f32 %v508_v15, %v161_v14  ;;  %v528_v18 = vpop.f32.mrf.mxu1  ;;  %v767_v51 = vpop.eup %766 }
 0x2c6   :  { %v532_v19 = vadd.f32 %v528_v18, %v202_v12 }
 0x2c7   :  { %564 = vmatmul.f32.vlgmr.msrb.gmra.mxu2 %v531_v16  ;;  %584 = vmatmul.f32.vlgmr.msrb.gmra.mxu3 %v531_v16 }
 0x2c8   :  { %533 = vmax.xlane.f32.xlu2 %v532_v19 }
 0x33b   :  { %v534_v53 = vpop.xlane.xlu2 %533 }
 0x33c   :  { %v535_v50 = vsub.f32 %v532_v19, %v534_v53 }
 0x33e   :  { %v536_v58 = vmul.f32 1.442695, %v535_v50 }
 0x34a   :  { %v565_v33 = vpop.f32.mrf.mxu2  ;;  %v585_v35 = vpop.f32.mrf.mxu3 }
 0x34b   :  { %v588_v39 = vadd.f32 %v565_v33, %v164_v31  ;;  %v1381_v41 = vadd.f32 %v585_v35, %v205_v27 }
 0x34d   :  { %590 = vmax.xlane.f32.xlu2 %v1381_v41  ;;  %621 = vmatmul.f32.vlgmr.msrb.gmra.mxu0 %v588_v39 }
 0x34e   :  { %641 = vmatmul.f32.vlgmr.msrb.gmra.mxu1 %v588_v39 }
 0x355   :  { %311 = vadd.xlane.f32.xlu2 %v765_v45 }
 0x35d   :  { %481 = vadd.xlane.f32.xlu2 %v767_v51 }
 0x3c0   :  { %v591_v55 = vpop.xlane.xlu2 %590 }
 0x3c1   :  { %v592_v32 = vsub.f32 %v1381_v41, %v591_v55 }
 0x3c3   :  { %v593_v17 = vmul.f32 1.442695, %v592_v32 }
 0x3c8   :  { %v312_v36 = vpop.xlane.xlu2 %311 }
 0x3c9   :  { %768 = vlog2.f32 %v312_v36 }
 0x3ca   :  { %v622_v40 = vpop.f32.mrf.mxu0  ;;  %770 = vpow2.f32 %v365_v42 }
 0x3cb   :  { %v645_v44 = vadd.f32 %v622_v40, %v167_v38  ;;  %v642_v46 = vpop.f32.mrf.mxu1 }
 0x3cc   :  { %v646_v48 = vadd.f32 %v642_v46, %v208_v61 }
 0x3cd   :  { %678 = vmatmul.f32.vlgmr.msra.gmra.mxu2 %v645_v44  ;;  %698 = vmatmul.f32.vlgmr.msra.gmra.mxu3 %v645_v44 }
 0x3ce   :  { %647 = vmax.xlane.f32.xlu0 %v646_v48 }
 0x3cf   :  { %v769_v49 = vpop.eup %768 }
 0x3d0   :  { %v314_v52 = vmul.f32 0.6931472, %v769_v49  ;;  %v482_v54 = vpop.xlane.xlu2 %481  ;;  %v771_v60 = vpop.eup %770 }
 0x3d1   :  { %772 = vlog2.f32 %v482_v54 }
 0x3d2   :  { %v315_v56 = vsub.f32 %v308_v25, %v314_v52  ;;  %774 = vpow2.f32 %v536_v58 }
 0x3d4   :  { %316 = vst [vmem:[#allocation11] sm:$0xff] %v315_v56 }
 0x3d6   :  { %367 = vadd.xlane.f32.xlu0 %v771_v60 }
 0x3d7   :  { %v773_v62 = vpop.eup %772 }
 0x3d8   :  { %v484_v63 = vmul.f32 0.6931472, %v773_v62  ;;  %v775_v3 = vpop.eup %774 }
 0x3da   :  { %v485_v2 = vsub.f32 %v478_v43, %v484_v63 }
 0x3dc   :  { %487 = vst [vmem:[#allocation11 + $0x18] sm:$0xff] %v485_v2 }
 0x3de   :  { %538 = vadd.xlane.f32.xlu0 %v775_v3 }
 0x441   :  { %v648_v5 = vpop.xlane.xlu0 %647 }
 0x442   :  { %v649_v7 = vsub.f32 %v646_v48, %v648_v5 }
 0x444   :  { %v650_v9 = vmul.f32 1.442695, %v649_v7 }
 0x446   :  { %776 = vpow2.f32 %v650_v9 }
 0x449   :  { %v368_v11 = vpop.xlane.xlu0 %367 }
 0x44a   :  { %778 = vlog2.f32 %v368_v11 }
 0x44c   :  { %v777_v23 = vpop.eup %776 }
 0x44d   :  { %652 = vadd.xlane.f32.xlu2 %v777_v23 }
 0x450   :  { %v779_v30 = vpop.eup %778  ;;  %v679_v1 = vpop.f32.mrf.mxu2 }
 0x451   :  { %v699_v4 = vpop.f32.mrf.mxu3  ;;  %v370_v6 = vmul.f32 0.6931472, %v779_v30  ;;  %v539_v8 = vpop.xlane.xlu0 %538  ;;  %v702_v10 = vadd.f32 %v679_v1, %v170_v26 }
 0x452   :  { %v703_v12 = vadd.f32 %v699_v4, %v211_v28  ;;  %780 = vlog2.f32 %v539_v8 }
 0x453   :  { %v371_v14 = vsub.f32 %v364_v59, %v370_v6  ;;  %716 = vst [vmem:[#allocation12] sm:$0xff] %v702_v10  ;;  %782 = vpow2.f32 %v422_v0 }
 0x454   :  { %704 = vmax.xlane.f32.xlu1 %v703_v12  ;;  %784 = vpow2.f32 %v593_v17  ;;  %740 = dma.vmem_to_hbm [thread:$0]  %s736_s19, 128, %s738_s22, [#allocation13]  }
 0x455   :  { %373 = vst [vmem:[#allocation11 + $0x8] sm:$0xff] %v371_v14 }
 0x458   :  { %v781_v13 = vpop.eup %780 }
 0x459   :  { %v541_v15 = vmul.f32 0.6931472, %v781_v13  ;;  %v783_v34 = vpop.eup %782 }
 0x45a   :  { %v785_v16 = vpop.eup %784 }
 0x45b   :  { %v542_v20 = vsub.f32 %v535_v50, %v541_v15 }
 0x45c   :  { %424 = vadd.xlane.f32.xlu1 %v783_v34 }
 0x45d   :  { %544 = vst [vmem:[#allocation11 + $0x20] sm:$0xff] %v542_v20 }
 0x464   :  { %595 = vadd.xlane.f32.xlu1 %v785_v16 }
 0x4c0   :  { %v653_v18 = vpop.xlane.xlu2 %652 }
 0x4c1   :  { %786 = vlog2.f32 %v653_v18 }
 0x4c7   :  { %v705_v19 = vpop.xlane.xlu1 %704  ;;  %v787_v21 = vpop.eup %786 }
 0x4c8   :  { %v706_v22 = vsub.f32 %v703_v12, %v705_v19  ;;  %v655_v25 = vmul.f32 0.6931472, %v787_v21 }
 0x4ca   :  { %v707_v27 = vmul.f32 1.442695, %v706_v22  ;;  %v656_v29 = vsub.f32 %v649_v7, %v655_v25 }
 0x4cc   :  { %788 = vpow2.f32 %v707_v27  ;;  %658 = vst [vmem:[#allocation11 + $0x30] sm:$0xff] %v656_v29 }
 0x4cf   :  { %v425_v31 = vpop.xlane.xlu1 %424 }
 0x4d0   :  { %790 = vlog2.f32 %v425_v31 }
 0x4d2   :  { %v789_v33 = vpop.eup %788 }
 0x4d3   :  { %709 = vadd.xlane.f32.xlu0 %v789_v33 }
 0x4d6   :  { %v791_v35 = vpop.eup %790 }
 0x4d7   :  { %v427_v37 = vmul.f32 0.6931472, %v791_v35  ;;  %v596_v39 = vpop.xlane.xlu1 %595 }
 0x4d8   :  { %792 = vlog2.f32 %v596_v39 }
 0x4d9   :  { %v428_v41 = vsub.f32 %v421_v24, %v427_v37 }
 0x4db   :  { %430 = vst [vmem:[#allocation11 + $0x10] sm:$0xff] %v428_v41 }
 0x4de   :  { %v793_v43 = vpop.eup %792 }
 0x4df   :  { %v598_v45 = vmul.f32 0.6931472, %v793_v43 }
 0x4e1   :  { %v599_v47 = vsub.f32 %v592_v32, %v598_v45 }
 0x4e3   :  { %601 = vst [vmem:[#allocation11 + $0x28] sm:$0xff] %v599_v47 }
 0x546   :  { %v710_v51 = vpop.xlane.xlu0 %709 }
 0x547   :  { %794 = vlog2.f32 %v710_v51 }
 0x54d   :  { %v795_v53 = vpop.eup %794 }
 0x54e   :  { %v712_v55 = vmul.f32 0.6931472, %v795_v53 }
 0x550   :  { %v713_v57 = vsub.f32 %v706_v22, %v712_v55 }
 0x552   :  { %715 = vst [vmem:[#allocation11 + $0x38] sm:$0xff] %v713_v57 }
 0x553   :  { %729 = dma.vmem_to_hbm [thread:$0]  %s722_s24, 1024, %s724_s26, [#allocation5], %s954_s9, %s954_s9, %s955_s10  }
 0x554   :  { %946 = dma.done.wait [#allocation5], 1024  }
 0x555   :  { %947 = vsyncadd [#allocation5], 4294966272 }
 0x556   :  { %948 = dma.done.wait [#allocation13], 128  }
 0x557   :  { %949 = vsyncadd [#allocation13], 4294967168 }
 0x558   :  { %749 = vsyncpa [#allocation4], 1 }
 0x559   :  { %750 = vsyncpa [#allocation7], 1 }
 0x55a   :  { %751 = vsyncpa [#allocation10], 1 }
 0x55b   :  { %752 = vsyncpa [#allocation5], 1 }
 0x55c   :  { %753 = vsyncpa [#allocation13], 1 }

</bundles_post_ra>
